<compile_context>
chip_gen: v5e
topology: v5e:2x2
jax: 0.10.0
libtpu: 0.0.40
codegen_flags: <defaults>
</compile_context>

<pallas_src>
import math

import jax
import jax.numpy as jnp
from jax.experimental import pallas as pl
from jax.experimental.pallas import tpu as pltpu

EMBEDDING_DIM = 312
HIDDEN_DIM = 256
LN_EPS = 1e-5


# ----------------------------- tuning helpers -------------------------------

def _round_up(x, m):
    return ((x + m - 1) // m) * m


def _vmem_capacity_bytes():
    """Physical VMEM per core, with a conservative fallback (v7x = 64 MiB/TC)."""
    try:
        info = pltpu.get_tpu_info()
        cap = getattr(info, "vmem_capacity_bytes", None)
        if cap:
            return int(cap)
    except Exception:
        pass
    return 64 << 20


def _gen_tuning():
    """(target_rows_per_step, vmem_limit_bytes) per TPU generation."""
    cap = _vmem_capacity_bytes()
    if cap >= (96 << 20):          # v5e / v6e: 128 MiB physical VMEM
        return 2048, 64 << 20
    # v7x: 64 MiB per TensorCore — smaller tiles, leave headroom.
    return 1024, 44 << 20


def _estimate_step_vmem(tb, s, d, h):
    """Rough per-grid-step VMEM bytes for a (TB, S, D) block (lane-padded)."""
    rows = tb * s
    d_pad = _round_up(d, 128)
    h_pad = _round_up(h, 128)
    io = 4 * rows * d_pad * 4                       # double-buffered x + out (f32)
    interm = 6 * rows * d_pad * 4                   # attn/h/ff/residual + bf16 staging
    ffn_mid = 3 * rows * h_pad * 4                  # z (f32) + bf16 copy
    scores = 3 * tb * _round_up(s, 8) * _round_up(s, 128) * 4   # scores / e / p
    weights = 2 * (2 * d_pad * h_pad * 4 + 6 * d_pad * 4)       # resident params
    return io + interm + ffn_mid + scores + weights


def _pick_batch_tile(B, S, D, H, target_rows, vmem_budget):
    """Largest TB with TB*S <= target_rows, fitting VMEM, and grid >= 2 if B >= 2."""
    max_tb = max(1, target_rows // max(S, 1))
    if B >= 2:
        max_tb = min(max_tb, max(1, -(-B // 2)))    # keep >= 2 grid steps (v7x dual-TC)
    tb = 1
    for cand in range(1, max_tb + 1):
        if _estimate_step_vmem(cand, S, D, H) <= vmem_budget:
            tb = cand
    return tb


# --------------------------------- kernel -----------------------------------

def _layer_norm(v, g, b):
    # One-pass variance: E[x^2] - mu^2 (both reductions can issue together).
    mu = jnp.mean(v, axis=-1, keepdims=True)
    ms = jnp.mean(v * v, axis=-1, keepdims=True)
    var = jnp.maximum(ms - mu * mu, 0.0)
    return (v - mu) * jax.lax.rsqrt(var + LN_EPS) * g + b


def _encoder_layer_kernel(x_ref, w1_ref, b1_ref, w2_ref, b2_ref,
                          g1_ref, be1_ref, g2_ref, be2_ref, o_ref):
    # x block is (TB, S, D): TB batch elements per grid step.
    x = x_ref[...].astype(jnp.float32)                               # (TB, S, D)
    tb, s, d = x.shape
    scale = 1.0 / math.sqrt(d)

    # --- self-attention (query = key = value = x), batched over TB ---
    scores = jnp.einsum("bqd,bkd->bqk", x, x,
                        preferred_element_type=jnp.float32) * scale  # (TB, S, S)
    m = jnp.max(scores, axis=-1, keepdims=True)
    e = jnp.exp(scores - m)
    # approx reciprocal lowers to the otherwise-idle EUP slot; error ~2^-12.
    p_attn = e * pl.reciprocal(jnp.sum(e, axis=-1, keepdims=True), approx=True)
    attn = jnp.einsum("bqk,bkd->bqd",
                      p_attn.astype(jnp.bfloat16), x.astype(jnp.bfloat16),
                      preferred_element_type=jnp.float32)            # (TB, S, D)

    # --- residual + LayerNorm1 ---
    h = _layer_norm(x + attn, g1_ref[...], be1_ref[...])

    # --- feed-forward: one tall (TB*S, D) matmul; bf16 in, f32 accumulate ---
    h2 = h.reshape(tb * s, d).astype(jnp.bfloat16)
    w1 = w1_ref[...].astype(jnp.bfloat16)
    z = jnp.dot(h2, w1, preferred_element_type=jnp.float32) + b1_ref[...]
    z = jnp.maximum(z, 0.0)
    w2 = w2_ref[...].astype(jnp.bfloat16)
    ff = jnp.dot(z.astype(jnp.bfloat16), w2,
                 preferred_element_type=jnp.float32) + b2_ref[...]
    ff = ff.reshape(tb, s, d)

    # --- residual + LayerNorm2 ---
    out = _layer_norm(h + ff, g2_ref[...], be2_ref[...])
    o_ref[...] = out.astype(o_ref.dtype)


# -------------------------------- wrapper ------------------------------------

def transformer_encoder_layer(x, params):
    """x: (B, S, D) float32. params: dict of weights (see init_params)."""
    B, S, D = x.shape
    H = params["w1t"].shape[1]

    target_rows, vmem_limit = _gen_tuning()
    TB = _pick_batch_tile(B, S, D, H, target_rows, int(vmem_limit * 0.7))

    # Robust to non-divisible B: zero-pad the batch, slice afterwards.
    B_pad = _round_up(B, TB)
    if B_pad != B:
        x_in = jnp.concatenate(
            [x, jnp.zeros((B_pad - B, S, D), x.dtype)], axis=0)
    else:
        x_in = x
    grid = (B_pad // TB,)

    # Resident constants (weights / biases / LN params) — same block every step.
    const2d = lambda shape: pl.BlockSpec(shape, lambda b: (0, 0))

    # Advisory cost hint for XLA scheduling around the custom call.
    cost = pl.CostEstimate(
        flops=4 * B_pad * S * S * D + 4 * B_pad * S * D * H,
        transcendentals=B_pad * S * S,
        bytes_accessed=2 * B_pad * S * D * 4 + (2 * D * H + 2 * D + H) * 4,
    )

    out = pl.pallas_call(
        _encoder_layer_kernel,
        out_shape=jax.ShapeDtypeStruct((B_pad, S, D), x.dtype),
        grid_spec=pltpu.PrefetchScalarGridSpec(
            num_scalar_prefetch=0,
            grid=grid,
            in_specs=[
                pl.BlockSpec((TB, S, D), lambda b: (b, 0, 0)),  # x
                const2d((D, H)),                                # W1^T
                const2d((1, H)),                                # b1
                const2d((H, D)),                                # W2^T
                const2d((1, D)),                                # b2
                const2d((1, D)),                                # LN1 gamma
                const2d((1, D)),                                # LN1 beta
                const2d((1, D)),                                # LN2 gamma
                const2d((1, D)),                                # LN2 beta
            ],
            out_specs=pl.BlockSpec((TB, S, D), lambda b: (b, 0, 0)),
        ),
        compiler_params=pltpu.CompilerParams(
            dimension_semantics=("parallel",),
            vmem_limit_bytes=vmem_limit,
        ),
        cost_estimate=cost,
    )(
        x_in,
        params["w1t"], params["b1"],
        params["w2t"], params["b2"],
        params["g1"], params["be1"],
        params["g2"], params["be2"],
    )

    return out[:B] if B_pad != B else out


# ------------------------------ params & reference ---------------------------

def init_params(key, embedding_dim=EMBEDDING_DIM, hidden_dim=HIDDEN_DIM):
    """Deterministic synthetic params mirroring the PyTorch module's shapes.

    nn.Linear(D, H):  weight (H, D), bias (H,)   -> stored pre-transposed (D, H)
    nn.Linear(H, D):  weight (D, H), bias (D,)   -> stored pre-transposed (H, D)
    nn.LayerNorm(D):  weight ones (D,), bias zeros (D,)  [PyTorch default init]
    """
    k1, k2, k3, k4 = jax.random.split(key, 4)
    D, H = embedding_dim, hidden_dim
    w1 = jax.random.normal(k1, (H, D), jnp.float32) * (1.0 / math.sqrt(D))
    b1 = jax.random.normal(k2, (H,), jnp.float32) * 0.01
    w2 = jax.random.normal(k3, (D, H), jnp.float32) * (1.0 / math.sqrt(H))
    b2 = jax.random.normal(k4, (D,), jnp.float32) * 0.01
    return {
        "w1t": w1.T,                       # (D, H)
        "b1": b1.reshape(1, H),
        "w2t": w2.T,                       # (H, D)
        "b2": b2.reshape(1, D),
        "g1": jnp.ones((1, D), jnp.float32),
        "be1": jnp.zeros((1, D), jnp.float32),
        "g2": jnp.ones((1, D), jnp.float32),
        "be2": jnp.zeros((1, D), jnp.float32),
    }


def _reference(x, params):
    """Pure-JAX f32 reference of the same forward pass (for a sanity check)."""
    D = x.shape[-1]
    scores = jnp.einsum("bqd,bkd->bqk", x, x) / math.sqrt(D)
    p = jax.nn.softmax(scores, axis=-1)
    attn = jnp.einsum("bqk,bkd->bqd", p, x)

    def ln(v, g, b):
        mu = jnp.mean(v, axis=-1, keepdims=True)
        var = jnp.mean((v - mu) ** 2, axis=-1, keepdims=True)
        return (v - mu) * jax.lax.rsqrt(var + LN_EPS) * g + b

    h = ln(x + attn, params["g1"][0], params["be1"][0])
    z = jnp.maximum(h @ params["w1t"] + params["b1"][0], 0.0)
    ff = z @ params["w2t"] + params["b2"][0]
    return ln(h + ff, params["g2"][0], params["be2"][0])


if __name__ == "__main__":
    key = jax.random.PRNGKey(0)
    kx, kp = jax.random.split(key)

    B, S, D = 2, 8, EMBEDDING_DIM
    x = jax.random.normal(kx, (B, S, D), jnp.float32)
    params = init_params(kp)

    out = transformer_encoder_layer(x, params)
    out = jax.block_until_ready(out)

    ref = _reference(x, params)
    assert out.shape == (B, S, D)
    # bf16-in / f32-accumulate matmuls => relaxed tolerance vs the f32 reference.
    assert jnp.allclose(out, ref, atol=3e-2, rtol=3e-2), float(
        jnp.max(jnp.abs(out - ref)))

    print("KERNEL_OK")
</pallas_src>

<mosaic_0001>
module attributes {stable_mosaic.version = 11 : i64} {
  func.func @_encoder_layer_kernel(%arg0: i32, %arg1: memref<1x8x312xf32, #tpu.memory_space<vmem>>, %arg2: memref<312x256xf32, #tpu.memory_space<vmem>>, %arg3: memref<1x256xf32, #tpu.memory_space<vmem>>, %arg4: memref<256x312xf32, #tpu.memory_space<vmem>>, %arg5: memref<1x312xf32, #tpu.memory_space<vmem>>, %arg6: memref<1x312xf32, #tpu.memory_space<vmem>>, %arg7: memref<1x312xf32, #tpu.memory_space<vmem>>, %arg8: memref<1x312xf32, #tpu.memory_space<vmem>>, %arg9: memref<1x312xf32, #tpu.memory_space<vmem>>, %arg10: memref<1x8x312xf32, #tpu.memory_space<vmem>>) attributes {dimension_semantics = [#tpu.dimension_semantics<parallel>], iteration_bounds = array<i64: 2>, scalar_prefetch = 0 : i64, scratch_operands = 0 : i64, tpu.core_type = #tpu.core_type<tc>, window_params = [{transform_indices = @transform_0, window_bounds = array<i64: 1, 8, 312>}, {pipeline_mode = #tpu.pipeline_mode<synchronous>, transform_indices = @transform_1, window_bounds = array<i64: 312, 256>}, {pipeline_mode = #tpu.pipeline_mode<synchronous>, transform_indices = @transform_2, window_bounds = array<i64: 1, 256>}, {pipeline_mode = #tpu.pipeline_mode<synchronous>, transform_indices = @transform_3, window_bounds = array<i64: 256, 312>}, {pipeline_mode = #tpu.pipeline_mode<synchronous>, transform_indices = @transform_4, window_bounds = array<i64: 1, 312>}, {pipeline_mode = #tpu.pipeline_mode<synchronous>, transform_indices = @transform_5, window_bounds = array<i64: 1, 312>}, {pipeline_mode = #tpu.pipeline_mode<synchronous>, transform_indices = @transform_6, window_bounds = array<i64: 1, 312>}, {pipeline_mode = #tpu.pipeline_mode<synchronous>, transform_indices = @transform_7, window_bounds = array<i64: 1, 312>}, {pipeline_mode = #tpu.pipeline_mode<synchronous>, transform_indices = @transform_8, window_bounds = array<i64: 1, 312>}, {transform_indices = @transform_9, window_bounds = array<i64: 1, 8, 312>}]} {
    %c0 = arith.constant 0 : index
    %c0_0 = arith.constant 0 : index
    %c0_1 = arith.constant 0 : index
    %0 = vector.load %arg1[%c0, %c0_0, %c0_1] : memref<1x8x312xf32, #tpu.memory_space<vmem>>, vector<1x8x312xf32>
    "tpu.trace_start"() <{level = 10 : i32, message = "bqd,bkd->bqk"}> : () -> ()
    %cst = arith.constant dense<0.000000e+00> : vector<1x8x8xf32>
    %1 = tpu.matmul %0, %0, %cst {dimension_numbers = #tpu.dot_dimension_numbers<[2], [2], [1], [1], [0, 0, 0, 1, 1, 1], [0], [0]>} : vector<1x8x312xf32>, vector<1x8x312xf32>, vector<1x8x8xf32> -> vector<1x8x8xf32>
    "tpu.trace_stop"() : () -> ()
    %cst_2 = arith.constant 0.0566138513 : f32
    %2 = vector.broadcast %cst_2 : f32 to vector<1x8x8xf32>
    %3 = arith.mulf %1, %2 : vector<1x8x8xf32>
    %cst_3 = arith.constant dense<0xFF800000> : vector<1x8xf32>
    %4 = vector.multi_reduction <maximumf>, %3, %cst_3 [2] : vector<1x8x8xf32> to vector<1x8xf32>
    %5 = vector.shape_cast %4 : vector<1x8xf32> to vector<1x8x1xf32>
    %6 = vector.broadcast %5 : vector<1x8x1xf32> to vector<1x8x8xf32>
    %7 = arith.subf %3, %6 : vector<1x8x8xf32>
    %8 = math.exp %7 : vector<1x8x8xf32>
    %cst_4 = arith.constant dense<0.000000e+00> : vector<1x8xf32>
    %9 = vector.multi_reduction <add>, %8, %cst_4 [2] : vector<1x8x8xf32> to vector<1x8xf32>
    %10 = vector.shape_cast %9 : vector<1x8xf32> to vector<1x8x1xf32>
    %11 = tpu.reciprocal %10 {approx = true} : vector<1x8x1xf32> -> vector<1x8x1xf32>
    %12 = vector.broadcast %11 : vector<1x8x1xf32> to vector<1x8x8xf32>
    %13 = arith.mulf %8, %12 : vector<1x8x8xf32>
    %14 = arith.truncf %13 : vector<1x8x8xf32> to vector<1x8x8xbf16>
    %15 = arith.truncf %0 : vector<1x8x312xf32> to vector<1x8x312xbf16>
    "tpu.trace_start"() <{level = 10 : i32, message = "bqk,bkd->bqd"}> : () -> ()
    %cst_5 = arith.constant dense<0.000000e+00> : vector<1x8x312xf32>
    %16 = tpu.matmul %14, %15, %cst_5 {dimension_numbers = #tpu.dot_dimension_numbers<[2], [1], [1], [2], [0, 0, 0, 1, 1, 2], [0], [0]>} : vector<1x8x8xbf16>, vector<1x8x312xbf16>, vector<1x8x312xf32> -> vector<1x8x312xf32>
    "tpu.trace_stop"() : () -> ()
    %17 = arith.addf %0, %16 : vector<1x8x312xf32>
    %c0_6 = arith.constant 0 : index
    %c0_7 = arith.constant 0 : index
    %18 = vector.load %arg6[%c0_6, %c0_7] : memref<1x312xf32, #tpu.memory_space<vmem>>, vector<1x312xf32>
    %c0_8 = arith.constant 0 : index
    %c0_9 = arith.constant 0 : index
    %19 = vector.load %arg7[%c0_8, %c0_9] : memref<1x312xf32, #tpu.memory_space<vmem>>, vector<1x312xf32>
    %cst_10 = arith.constant dense<0.000000e+00> : vector<1x8xf32>
    %20 = vector.multi_reduction <add>, %17, %cst_10 [2] : vector<1x8x312xf32> to vector<1x8xf32>
    %21 = vector.shape_cast %20 : vector<1x8xf32> to vector<1x8x1xf32>
    %cst_11 = arith.constant 3.120000e+02 : f32
    %22 = vector.broadcast %cst_11 : f32 to vector<1x8x1xf32>
    %23 = arith.divf %21, %22 : vector<1x8x1xf32>
    %24 = arith.mulf %17, %17 : vector<1x8x312xf32>
    %cst_12 = arith.constant dense<0.000000e+00> : vector<1x8xf32>
    %25 = vector.multi_reduction <add>, %24, %cst_12 [2] : vector<1x8x312xf32> to vector<1x8xf32>
    %26 = vector.shape_cast %25 : vector<1x8xf32> to vector<1x8x1xf32>
    %cst_13 = arith.constant 3.120000e+02 : f32
    %27 = vector.broadcast %cst_13 : f32 to vector<1x8x1xf32>
    %28 = arith.divf %26, %27 : vector<1x8x1xf32>
    %29 = arith.mulf %23, %23 : vector<1x8x1xf32>
    %30 = arith.subf %28, %29 : vector<1x8x1xf32>
    %cst_14 = arith.constant 0.000000e+00 : f32
    %31 = vector.broadcast %cst_14 : f32 to vector<1x8x1xf32>
    %32 = arith.maximumf %30, %31 : vector<1x8x1xf32>
    %33 = vector.broadcast %23 : vector<1x8x1xf32> to vector<1x8x312xf32>
    %34 = arith.subf %17, %33 : vector<1x8x312xf32>
    %cst_15 = arith.constant 9.99999974E-6 : f32
    %35 = vector.broadcast %cst_15 : f32 to vector<1x8x1xf32>
    %36 = arith.addf %32, %35 : vector<1x8x1xf32>
    %37 = math.rsqrt %36 : vector<1x8x1xf32>
    %38 = vector.broadcast %37 : vector<1x8x1xf32> to vector<1x8x312xf32>
    %39 = arith.mulf %34, %38 : vector<1x8x312xf32>
    %40 = vector.shape_cast %18 : vector<1x312xf32> to vector<1x1x312xf32>
    %41 = vector.broadcast %40 : vector<1x1x312xf32> to vector<1x8x312xf32>
    %42 = arith.mulf %39, %41 : vector<1x8x312xf32>
    %43 = vector.shape_cast %19 : vector<1x312xf32> to vector<1x1x312xf32>
    %44 = vector.broadcast %43 : vector<1x1x312xf32> to vector<1x8x312xf32>
    %45 = arith.addf %42, %44 : vector<1x8x312xf32>
    %46 = vector.shape_cast %45 : vector<1x8x312xf32> to vector<8x312xf32>
    %47 = arith.truncf %46 : vector<8x312xf32> to vector<8x312xbf16>
    %c0_16 = arith.constant 0 : index
    %c0_17 = arith.constant 0 : index
    %48 = vector.load %arg2[%c0_16, %c0_17] : memref<312x256xf32, #tpu.memory_space<vmem>>, vector<312x256xf32>
    %49 = arith.truncf %48 : vector<312x256xf32> to vector<312x256xbf16>
    %cst_18 = arith.constant dense<0.000000e+00> : vector<8x256xf32>
    %50 = tpu.matmul %47, %49, %cst_18 {dimension_numbers = #tpu.dot_dimension_numbers<[1], [0], [0], [1], [0, 0, 1, 1], [], []>} : vector<8x312xbf16>, vector<312x256xbf16>, vector<8x256xf32> -> vector<8x256xf32>
    %c0_19 = arith.constant 0 : index
    %c0_20 = arith.constant 0 : index
    %51 = vector.load %arg3[%c0_19, %c0_20] : memref<1x256xf32, #tpu.memory_space<vmem>>, vector<1x256xf32>
    %52 = vector.broadcast %51 : vector<1x256xf32> to vector<8x256xf32>
    %53 = arith.addf %50, %52 : vector<8x256xf32>
    %cst_21 = arith.constant 0.000000e+00 : f32
    %54 = vector.broadcast %cst_21 : f32 to vector<8x256xf32>
    %55 = arith.maximumf %53, %54 : vector<8x256xf32>
    %c0_22 = arith.constant 0 : index
    %c0_23 = arith.constant 0 : index
    %56 = vector.load %arg4[%c0_22, %c0_23] : memref<256x312xf32, #tpu.memory_space<vmem>>, vector<256x312xf32>
    %57 = arith.truncf %56 : vector<256x312xf32> to vector<256x312xbf16>
    %58 = arith.truncf %55 : vector<8x256xf32> to vector<8x256xbf16>
    %cst_24 = arith.constant dense<0.000000e+00> : vector<8x312xf32>
    %59 = tpu.matmul %58, %57, %cst_24 {dimension_numbers = #tpu.dot_dimension_numbers<[1], [0], [0], [1], [0, 0, 1, 1], [], []>} : vector<8x256xbf16>, vector<256x312xbf16>, vector<8x312xf32> -> vector<8x312xf32>
    %c0_25 = arith.constant 0 : index
    %c0_26 = arith.constant 0 : index
    %60 = vector.load %arg5[%c0_25, %c0_26] : memref<1x312xf32, #tpu.memory_space<vmem>>, vector<1x312xf32>
    %61 = vector.broadcast %60 : vector<1x312xf32> to vector<8x312xf32>
    %62 = arith.addf %59, %61 : vector<8x312xf32>
    %63 = vector.shape_cast %62 : vector<8x312xf32> to vector<1x8x312xf32>
    %64 = arith.addf %45, %63 : vector<1x8x312xf32>
    %c0_27 = arith.constant 0 : index
    %c0_28 = arith.constant 0 : index
    %65 = vector.load %arg8[%c0_27, %c0_28] : memref<1x312xf32, #tpu.memory_space<vmem>>, vector<1x312xf32>
    %c0_29 = arith.constant 0 : index
    %c0_30 = arith.constant 0 : index
    %66 = vector.load %arg9[%c0_29, %c0_30] : memref<1x312xf32, #tpu.memory_space<vmem>>, vector<1x312xf32>
    %cst_31 = arith.constant dense<0.000000e+00> : vector<1x8xf32>
    %67 = vector.multi_reduction <add>, %64, %cst_31 [2] : vector<1x8x312xf32> to vector<1x8xf32>
    %68 = vector.shape_cast %67 : vector<1x8xf32> to vector<1x8x1xf32>
    %cst_32 = arith.constant 3.120000e+02 : f32
    %69 = vector.broadcast %cst_32 : f32 to vector<1x8x1xf32>
    %70 = arith.divf %68, %69 : vector<1x8x1xf32>
    %71 = arith.mulf %64, %64 : vector<1x8x312xf32>
    %cst_33 = arith.constant dense<0.000000e+00> : vector<1x8xf32>
    %72 = vector.multi_reduction <add>, %71, %cst_33 [2] : vector<1x8x312xf32> to vector<1x8xf32>
    %73 = vector.shape_cast %72 : vector<1x8xf32> to vector<1x8x1xf32>
    %cst_34 = arith.constant 3.120000e+02 : f32
    %74 = vector.broadcast %cst_34 : f32 to vector<1x8x1xf32>
    %75 = arith.divf %73, %74 : vector<1x8x1xf32>
    %76 = arith.mulf %70, %70 : vector<1x8x1xf32>
    %77 = arith.subf %75, %76 : vector<1x8x1xf32>
    %cst_35 = arith.constant 0.000000e+00 : f32
    %78 = vector.broadcast %cst_35 : f32 to vector<1x8x1xf32>
    %79 = arith.maximumf %77, %78 : vector<1x8x1xf32>
    %80 = vector.broadcast %70 : vector<1x8x1xf32> to vector<1x8x312xf32>
    %81 = arith.subf %64, %80 : vector<1x8x312xf32>
    %cst_36 = arith.constant 9.99999974E-6 : f32
    %82 = vector.broadcast %cst_36 : f32 to vector<1x8x1xf32>
    %83 = arith.addf %79, %82 : vector<1x8x1xf32>
    %84 = math.rsqrt %83 : vector<1x8x1xf32>
    %85 = vector.broadcast %84 : vector<1x8x1xf32> to vector<1x8x312xf32>
    %86 = arith.mulf %81, %85 : vector<1x8x312xf32>
    %87 = vector.shape_cast %65 : vector<1x312xf32> to vector<1x1x312xf32>
    %88 = vector.broadcast %87 : vector<1x1x312xf32> to vector<1x8x312xf32>
    %89 = arith.mulf %86, %88 : vector<1x8x312xf32>
    %90 = vector.shape_cast %66 : vector<1x312xf32> to vector<1x1x312xf32>
    %91 = vector.broadcast %90 : vector<1x1x312xf32> to vector<1x8x312xf32>
    %92 = arith.addf %89, %91 : vector<1x8x312xf32>
    %c0_37 = arith.constant 0 : index
    %c0_38 = arith.constant 0 : index
    %c0_39 = arith.constant 0 : index
    %93 = vector.load %arg10[%c0_37, %c0_38, %c0_39] : memref<1x8x312xf32, #tpu.memory_space<vmem>>, vector<1x8x312xf32>
    tpu.vector_store %arg10[%c0_37, %c0_38, %c0_39], %92 {strides = array<i32>} : memref<1x8x312xf32, #tpu.memory_space<vmem>>, vector<1x8x312xf32>,
    return
  }
  func.func @transform_0(%arg0: i32) -> (i32, i32, i32) {
    %c0_i32 = arith.constant 0 : i32
    %c0_i32_0 = arith.constant 0 : i32
    %c0_i32_1 = arith.constant 0 : i32
    return %arg0, %c0_i32, %c0_i32_0 : i32, i32, i32
  }
  func.func @transform_1(%arg0: i32) -> (i32, i32) {
    %c0_i32 = arith.constant 0 : i32
    %c0_i32_0 = arith.constant 0 : i32
    %c0_i32_1 = arith.constant 0 : i32
    return %c0_i32, %c0_i32_0 : i32, i32
  }
  func.func @transform_2(%arg0: i32) -> (i32, i32) {
    %c0_i32 = arith.constant 0 : i32
    %c0_i32_0 = arith.constant 0 : i32
    %c0_i32_1 = arith.constant 0 : i32
    return %c0_i32, %c0_i32_0 : i32, i32
  }
  func.func @transform_3(%arg0: i32) -> (i32, i32) {
    %c0_i32 = arith.constant 0 : i32
    %c0_i32_0 = arith.constant 0 : i32
    %c0_i32_1 = arith.constant 0 : i32
    return %c0_i32, %c0_i32_0 : i32, i32
  }
  func.func @transform_4(%arg0: i32) -> (i32, i32) {
    %c0_i32 = arith.constant 0 : i32
    %c0_i32_0 = arith.constant 0 : i32
    %c0_i32_1 = arith.constant 0 : i32
    return %c0_i32, %c0_i32_0 : i32, i32
  }
  func.func @transform_5(%arg0: i32) -> (i32, i32) {
    %c0_i32 = arith.constant 0 : i32
    %c0_i32_0 = arith.constant 0 : i32
    %c0_i32_1 = arith.constant 0 : i32
    return %c0_i32, %c0_i32_0 : i32, i32
  }
  func.func @transform_6(%arg0: i32) -> (i32, i32) {
    %c0_i32 = arith.constant 0 : i32
    %c0_i32_0 = arith.constant 0 : i32
    %c0_i32_1 = arith.constant 0 : i32
    return %c0_i32, %c0_i32_0 : i32, i32
  }
  func.func @transform_7(%arg0: i32) -> (i32, i32) {
    %c0_i32 = arith.constant 0 : i32
    %c0_i32_0 = arith.constant 0 : i32
    %c0_i32_1 = arith.constant 0 : i32
    return %c0_i32, %c0_i32_0 : i32, i32
  }
  func.func @transform_8(%arg0: i32) -> (i32, i32) {
    %c0_i32 = arith.constant 0 : i32
    %c0_i32_0 = arith.constant 0 : i32
    %c0_i32_1 = arith.constant 0 : i32
    return %c0_i32, %c0_i32_0 : i32, i32
  }
  func.func @transform_9(%arg0: i32) -> (i32, i32, i32) {
    %c0_i32 = arith.constant 0 : i32
    %c0_i32_0 = arith.constant 0 : i32
    %c0_i32_1 = arith.constant 0 : i32
    return %arg0, %c0_i32, %c0_i32_0 : i32, i32, i32
  }
}

</mosaic_0001>

<bundles_post_ra>
// kernel: tpu_custom_call.1
= control target key start
LH: loop header
LB: loop body
LE: loop exit
PB: predicated region body
PF: predicated region fallthrough
CT: control target
= control target key end

     0   :  { %14 = vsyncpa [#allocation3], 0  ;;  %s2014_s0 = inlined_call_operand.vmem [shape: f32[2,8,312], index: 0, kind: input, shape index: {}]   ;;  %s2015_s1 = inlined_call_operand.vmem [shape: f32[312,256], index: 1, kind: input, shape index: {}]   ;;  %s2016_s2 = inlined_call_operand.vmem [shape: f32[1,256], index: 2, kind: input, shape index: {}]   ;;  %s2017_s3 = inlined_call_operand.vmem [shape: f32[256,312], index: 3, kind: input, shape index: {}]   ;;  %s2018_s4 = inlined_call_operand.vmem [shape: f32[1,312], index: 4, kind: input, shape index: {}]   ;;  %s2019_s5 = inlined_call_operand.vmem [shape: f32[1,312], index: 5, kind: input, shape index: {}]   ;;  %s2020_s6 = inlined_call_operand.vmem [shape: f32[1,312], index: 6, kind: input, shape index: {}]   ;;  %s2021_s7 = inlined_call_operand.vmem [shape: f32[1,312], index: 7, kind: input, shape index: {}]   ;;  %s2022_s8 = inlined_call_operand.vmem [shape: f32[1,312], index: 8, kind: input, shape index: {}]   ;;  %s2023_s9 = inlined_call_operand.hbm [shape: f32[2,8,312], index: 9, kind: output, shape index: {}]  }
   0x1   :  { %16 = vsyncpa [#allocation3 + $0x1], 0  ;;  %s1312_s30 = smov 0   ;;  %s1314_s10 = smov 0  }
   0x2   :  { %s1316_s11 = smov 0   ;;  %s1318_s12 = smov 0  }
   0x3 LB: > { %s1333_s13 = sadd.s32 4294967295, %s1259_s12   ;;  %s1129_s14 = sadd.s32 4294967294, %s1259_s12   ;;  %s1259_s12 = sphi %s1318_s12, %s2029_s12   ;;  %s1255_s11 = sphi %s1316_s11, %s2028_s11   ;;  %s1251_s10 = sphi %s1314_s10, %s2027_s10   ;;  %s1247_s30 = sphi %s1312_s30, %s2026_s30  }
   0x4   : > { %s1337_s15 = sadd.s32 1, %s1259_s12   ;;  %s223_s16 = sadd.s32 1, %s1255_s11 }
   0x5   : > { %s220_s17 = ssub.s32 %s1259_s12, %s1337_s15  ;;  %p233_p0 = scmp.ne.s32.totalorder %s1255_s11, %s1251_s10 }
   0x6   : > { %p221_p1 = scmp.eq.s32.totalorder %s220_s17, 0  ;;  %p234_p2 = scmp.eq.s32.totalorder %s1333_s13, 1 }
   0x7   : > { %p239_p3 = scmp.ne.s32.totalorder %s1251_s10, %s1247_s30  ;;  %p240_p4 = scmp.eq.s32.totalorder %s1129_s14, 1 }
   0x8   : > { %s1348_s18 = scalar_select %p221_p1, %s1255_s11, %s223_s16  }
   0x9   : > { %p1350_p5 = por %p234_p2, %p233_p0  ;;  %p1354_p6 = por %p240_p4, %p239_p3 }
   0xa   : > { %p1132_p7 = scmp.ge.s32.totalorder %s1259_s12, 1  ;;  %p290_p8 = scmp.lt.s32.totalorder %s1259_s12, 3 }
   0xc   : > { %p291_p9 = pnand %p1132_p7, %p290_p8 }
   0xd   : > { %p326_p10 = scmp.lt.s32.totalorder (!%p291_p9), %s1333_s13, 1  ;;  %s1146_s28 = smul.u32 (!%p291_p9), 24, %s1333_s13 }
   0xe   : > { %294 = sbr.rel (%p291_p9) target bundleno = 1188 (0x4a4), region = 56 }
  0x13   : > { %s327_s21 = scalar_select %p326_p10, %s1333_s13, 1  ;;  %vm335_vm0 = vcmask 457728   ;;  %vm400_vm1 = vcmask 64512   ;;  %vm426_vm2 = vcmask 1043456   ;;  %v1261_v48 = vmov 312.0   ;;  %v573_v49 = vld [vmem:[%s2015_s1 + $0xe0] sm:$0xff] }
  0x14   : > { %v575_v50 = vld [vmem:[%s2015_s1 + $0xf0] sm:$0xff]  ;;  %v605_v51 = vld [vmem:[%s2015_s1 + $0x1e0] sm:$0xff]  ;;  %v574_v54 = vld [vmem:[%s2015_s1 + $0xe8] sm:$0xff]  ;;  %s1065_s13 = scalar_lea.hbm %s2023_s9, %s1146_s28  ;;  %s1217_s28 = scalar_lea.hbm %s2023_s9, 48 }
  0x15   : > { %s1145_s22 = smul.u32 24, %s327_s21  ;;  %v637_v52 = vpack.c.bf16 %v575_v50, %v573_v49  ;;  %v607_v53 = vld [vmem:[%s2015_s1 + $0x1f0] sm:$0xff]  ;;  %v576_v55 = vld [vmem:[%s2015_s1 + $0xf8] sm:$0xff]  ;;  %v621_v58 = vld [vmem:[%s2015_s1 + $0x260] sm:$0xff]  ;;  %s1069_s21 = sshll.u32 %s1065_s13, 4  ;;  %s1070_s21 = int_to_ptr.hbm [resolvable:$true] %s1069_s21 }
  0x16   : > { %v653_v56 = vpack.c.bf16 %v607_v53, %v605_v51  ;;  %v638_v57 = vpack.c.bf16 %v576_v55, %v574_v54  ;;  %v661_v59 = vpack.c.bf16 %v621_v58, %v621_v58  ;;  %v569_v60 = vld [vmem:[%s2015_s1 + $0xc0] sm:$0xff]  ;;  %v571_v61 = vld [vmem:[%s2015_s1 + $0xd0] sm:$0xff]  ;;  %v606_v49 = vld [vmem:[%s2015_s1 + $0x1e8] sm:$0xff] }
  0x17   : > { %s330_s25 = scalar_lea.vmem %s2014_s0, %s1145_s22  ;;  %v601_v62 = vld [vmem:[%s2015_s1 + $0x1c0] sm:$0xff]  ;;  %v608_v50 = vld [vmem:[%s2015_s1 + $0x1f8] sm:$0xff]  ;;  %v555_v54 = vld [vmem:[%s2015_s1 + $0x50] sm:$0xff]  ;;  %s323_s22 = sand.u32 1, %s1251_s10  }
  0x18   : > { %v333_v0 = vld [vmem:[%s330_s25 + $0x8] sm:$0xff]  ;;  %v334_v1 = vld [vmem:[%s330_s25 + $0x10] sm:$0xff]  ;;  %v332_v2 = vld [vmem:[%s330_s25] sm:$0xff]  ;;  %v654_v51 = vpack.c.bf16 %v608_v50, %v606_v49  ;;  %s1144_s23 = smul.u32 24, %s323_s22  ;;  %s1054_s24 = scalar_lea.sflag [#allocation3], %s323_s22 }
  0x19   : > { %374 = vmatpush.xpose.msra.mxu2 %v333_v0  ;;  %354 = vmatpush.xpose.msra.mxu0 %v332_v2  ;;  %v413_v15 = vpack.c.bf16 %v333_v0, %v332_v2  ;;  %v414_v16 = vpack.c.bf16 %v334_v1, %v334_v1  ;;  %v553_v53 = vld [vmem:[%s2015_s1 + $0x40] sm:$0xff]  ;;  %v554_v58 = vld [vmem:[%s2015_s1 + $0x48] sm:$0xff]  ;;  %s1211_s25 = sshra.s32 %s1070_s21, 4  ;;  %s1212_s25 = int_to_ptr.hbm [resolvable:$true] %s1211_s25 }
  0x1a   : > { %v585_v55 = vld [vmem:[%s2015_s1 + $0x140] sm:$0xff]  ;;  %s325_s16 = scalar_lea.vmem [#allocation2], %s1144_s23  ;;  %s1213_s26 = scalar_lea.hbm %s1212_s25, 24 }
  0x1b   : > { %v417_v17 = vunpack.c.l.b16 %v413_v15  ;;  %v418_v18 = vunpack.c.h.b16 %v413_v15  ;;  %v419_v19 = vunpack.c.l.b16 %v414_v16  ;;  %v599_v15 = vld [vmem:[%s2015_s1 + $0x1b0] sm:$0xff]  ;;  %v566_v16 = vld [vmem:[%s2015_s1 + $0xa8] sm:$0xff]  ;;  %s1067_s17 = sshll.u32 %s325_s16, 4  ;;  %p1214_p11 = scmp.ne.s32.totalorder %s1212_s25, %s1213_s26  ;;  %s1068_s17 = int_to_ptr.vmem [resolvable:$true] %s1067_s17 }
  0x1c   : > { %375 = vmatmul.f32.vlgmr.msra.gmra.mxu2 %v333_v0  ;;  %355 = vmatmul.f32.vlgmr.msra.gmra.mxu0 %v332_v2  ;;  %p1218_p0 = scmp.lt.s32.totalorder %s1212_s25, %s2023_s9  ;;  %p1219_p1 = scmp.lt.s32.totalorder %s1217_s28, %s1213_s26 }
  0x1d   : > { %1134 = vmatpush.xpose.msk.msrb.mxu2 %vm335_vm0, %v334_v1  ;;  %v420_v20 = vpack.c.b16 %v417_v17, %v417_v17  ;;  %v421_v21 = vpack.c.b16 %v418_v18, %v418_v18  ;;  %v422_v22 = vpack.c.b16 %v419_v19, %v419_v19  ;;  %v568_v17 = vld [vmem:[%s2015_s1 + $0xb8] sm:$0xff]  ;;  %p1215_p12 = pnand %p1214_p11, %p1350_p5 }
  0x1e   : > { %v634_v19 = vpack.c.bf16 %v568_v17, %v566_v16  ;;  %v545_v16 = vld [vmem:[%s2015_s1] sm:$0xff]  ;;  %v547_v17 = vld [vmem:[%s2015_s1 + $0x10] sm:$0xff]  ;;  %p1220_p2 = por %p1219_p1, %p1218_p0 }
  0x1f   : > { %v428_v23 = vsel %vm426_vm2, %v420_v20, 0  ;;  %v431_v24 = vsel %vm426_vm2, %v421_v21, 0  ;;  %v434_v25 = vsel %vm426_vm2, %v422_v22, 0  ;;  %v613_v20 = vld [vmem:[%s2015_s1 + $0x220] sm:$0xff]  ;;  %v615_v21 = vld [vmem:[%s2015_s1 + $0x230] sm:$0xff]  ;;  %p1216_p13 = pneg %p1215_p12 }
  0x20   : > { %443 = vmatpush.bf16.msra.mxu3 %v428_v23  ;;  %456 = vmatpush.bf16.msrb.mxu0 %v431_v24  ;;  %v657_v23 = vpack.c.bf16 %v615_v21, %v613_v20  ;;  %v561_v24 = vld [vmem:[%s2015_s1 + $0x80] sm:$0xff]  ;;  %v579_v20 = vld [vmem:[%s2015_s1 + $0x110] sm:$0xff]  ;;  %v546_v21 = vld [vmem:[%s2015_s1 + $0x8] sm:$0xff] }
  0x21   : > { %469 = vmatpush.bf16.msra.mxu1 %v434_v25  ;;  %678 = vmatpush.bf16.msra.mxu2 %v637_v52  ;;  %v563_v25 = vld [vmem:[%s2015_s1 + $0x90] sm:$0xff]  ;;  %p1221_p3 = pnand %p1220_p2, %p1216_p13 }
  0x24   : > { %1135 = vmatmul.msk.f32.vlgmr.msrb.gmra.mxu2 %vm335_vm0, %v334_v1  ;;  %691 = vmatpush.bf16.msrb.mxu3 %v653_v56  ;;  %v627_v56 = vpack.c.bf16 %v555_v54, %v553_v53  ;;  %v610_v54 = vld [vmem:[%s2015_s1 + $0x208] sm:$0xff] }
  0x25   : > { %717 = vmatpush.bf16.msrb.mxu1 %v638_v57  ;;  %v587_v57 = vld [vmem:[%s2015_s1 + $0x150] sm:$0xff] }
  0x99   : > { %v356_v4 = vpop.f32.mrf.mxu0 }
  0x9f   : > { %v376_v3 = vpop.f32.mrf.mxu2 }
  0xa0   : > { %v377_v5 = vadd.f32 %v376_v3, %v356_v4  ;;  %v570_v3 = vld [vmem:[%s2015_s1 + $0xc8] sm:$0xff]  ;;  %v572_v4 = vld [vmem:[%s2015_s1 + $0xd8] sm:$0xff] }
  0xa7   : > { %v396_v6 = vpop.f32.mrf.mxu2 }
  0xa8   : > { %v397_v7 = vadd.f32 %v396_v6, %v377_v5  ;;  %v636_v6 = vpack.c.bf16 %v572_v4, %v570_v3  ;;  %v549_v4 = vld [vmem:[%s2015_s1 + $0x20] sm:$0xff] }
  0xaa   : > { %v399_v8 = vmul.f32 0.05661385, %v397_v7  ;;  %v617_v7 = vld [vmem:[%s2015_s1 + $0x240] sm:$0xff]  ;;  %718 = vmatpush.bf16.msrb.mxu1 %v636_v6 }
  0xab   : > { %v581_v6 = vld [vmem:[%s2015_s1 + $0x120] sm:$0xff] }
  0xac   : > { %v401_v9 = vsel %vm400_vm1, %v399_v8, -inf }
  0xad   : > { %402 = vmax.xlane.f32.xlu0 %v401_v9 }
  0xae   : > { %719 = vmatpush.bf16.msrb.mxu1 %v634_v19  ;;  %v623_v19 = vpack.c.bf16 %v547_v17, %v545_v16 }
 0x120   : > { %v403_v10 = vpop.xlane.xlu0 %402 }
 0x121   : > { %v404_v11 = vsub.f32 %v399_v8, %v403_v10  ;;  %v619_v8 = vld [vmem:[%s2015_s1 + $0x250] sm:$0xff] }
 0x122   : > { %v659_v10 = vpack.c.bf16 %v619_v8, %v617_v7  ;;  %v550_v7 = vld [vmem:[%s2015_s1 + $0x28] sm:$0xff]  ;;  %v552_v8 = vld [vmem:[%s2015_s1 + $0x38] sm:$0xff] }
 0x123   : > { %v405_v12 = vmul.f32 1.442695, %v404_v11  ;;  %v565_v11 = vld [vmem:[%s2015_s1 + $0xa0] sm:$0xff] }
 0x125   : > { %1187 = vpow2.f32 %v405_v12  ;;  %v567_v12 = vld [vmem:[%s2015_s1 + $0xb0] sm:$0xff] }
 0x12b   : > { %v1188_v13 = vpop.eup %1187 }
 0x12c   : > { %v407_v14 = vsel %vm400_vm1, %v1188_v13, 0.0 }
 0x12d   : > { %408 = vadd.xlane.f32.xlu0 %v407_v14  ;;  %v633_v14 = vpack.c.bf16 %v567_v12, %v565_v11  ;;  %v626_v11 = vpack.c.bf16 %v552_v8, %v550_v7  ;;  %v598_v12 = vld [vmem:[%s2015_s1 + $0x1a8] sm:$0xff]  ;;  %v797_v7 = vld [vmem:[%s2017_s3 + $0x138] sm:$0xff] }
 0x1a0   : > { %v409_v26 = vpop.xlane.xlu0 %408 }
 0x1a1   : > { %1189 = vrcp.f32 %v409_v26  ;;  %v593_v26 = vld [vmem:[%s2015_s1 + $0x180] sm:$0xff] }
 0x1a2   : > { %1191 = vrcp.f32 %v1261_v48 }
 0x1a7   : > { %v1190_v27 = vpop.eup %1189 }
 0x1a8   : > { %v411_v28 = vmul.f32 %v1190_v27, %v1188_v13  ;;  %v1422_v63 = vpop.eup %1191  ;;  %v597_v13 = vld [vmem:[%s2015_s1 + $0x1a0] sm:$0xff]  ;;  %v631_v27 = vpack.c.bf16 %v563_v25, %v561_v24  ;;  %v594_v25 = vld [vmem:[%s2015_s1 + $0x188] sm:$0xff] }
 0x1a9   : > { %v486_v9 = vmul.f32 312.0, %v1422_v63  ;;  %v649_v18 = vpack.c.bf16 %v599_v15, %v597_v13  ;;  %vm490_vm3 = vweird.f32 %v1422_v63  ;;  %v600_v13 = vld [vmem:[%s2015_s1 + $0x1b8] sm:$0xff] }
 0x1aa   : > { %v412_v29 = vpack.c.bf16 %v411_v28, %v411_v28  ;;  %v595_v28 = vld [vmem:[%s2015_s1 + $0x190] sm:$0xff]  ;;  %v650_v15 = vpack.c.bf16 %v600_v13, %v598_v12 }
 0x1ab   : > { %v487_v22 = vsub.f32 1.0, %v486_v9 }
 0x1ac   : > { %1136 = vmatmul.msk.bf16.vlgmr.msra.gmra.mxu3 %vm400_vm1, %v412_v29  ;;  %1137 = vmatmul.msk.bf16.vlgmr.msrb.gmra.mxu0 %vm400_vm1, %v412_v29 }
 0x1ad   : > { %1138 = vmatmul.msk.bf16.vlgmr.msra.gmra.mxu1 %vm400_vm1, %v412_v29  ;;  %v562_v29 = vld [vmem:[%s2015_s1 + $0x88] sm:$0xff] }
 0x229   : > { %v458_v30 = vpop.f32.mrf.mxu0 }
 0x22a   : > { %v471_v31 = vpop.f32.mrf.mxu1  ;;  %v1377_v34 = vadd.f32 %v458_v30, %v333_v0  ;;  %v673_v0 = vsel %vm426_vm2, %v661_v59, 0  ;;  %v564_v30 = vld [vmem:[%s2015_s1 + $0x98] sm:$0xff] }
 0x22b   : > { %v1375_v32 = vadd.f32 %v471_v31, %v334_v1  ;;  %v635_v1 = vpack.c.bf16 %v571_v61, %v569_v60  ;;  %708 = vmatpush.bf16.msra.mxu0 %v673_v0  ;;  %v647_v31 = vpack.c.bf16 %v595_v28, %v593_v26  ;;  %v556_v59 = vld [vmem:[%s2015_s1 + $0x58] sm:$0xff]  ;;  %v643_v61 = vpack.c.bf16 %v587_v57, %v585_v55  ;;  %v602_v0 = vld [vmem:[%s2015_s1 + $0x1c8] sm:$0xff] }
 0x22c   : > { %v494_v42 = vmul.f32 %v1377_v34, %v1377_v34  ;;  %v596_v26 = vld [vmem:[%s2015_s1 + $0x198] sm:$0xff]  ;;  %v578_v57 = vld [vmem:[%s2015_s1 + $0x108] sm:$0xff] }
 0x22d   : > { %v481_v39 = vsel %vm335_vm0, %v1375_v32, 0.0  ;;  %v495_v44 = vmul.f32 %v1375_v32, %v1375_v32  ;;  %679 = vmatpush.bf16.msra.mxu2 %v635_v1  ;;  %v604_v1 = vld [vmem:[%s2015_s1 + $0x1d8] sm:$0xff]  ;;  %v648_v28 = vpack.c.bf16 %v596_v26, %v594_v25 }
 0x22e   : > { %v612_v55 = vld [vmem:[%s2015_s1 + $0x218] sm:$0xff] }
 0x22f   : > { %v445_v33 = vpop.f32.mrf.mxu3  ;;  %v497_v46 = vsel %vm335_vm0, %v495_v44, 0.0  ;;  %709 = vmatpush.bf16.msra.mxu0 %v659_v10  ;;  %v591_v44 = vld [vmem:[%s2015_s1 + $0x170] sm:$0xff] }
 0x230   : > { %v1379_v35 = vadd.f32 %v445_v33, %v332_v2  ;;  %v603_v2 = vld [vmem:[%s2015_s1 + $0x1d0] sm:$0xff]  ;;  %v632_v33 = vpack.c.bf16 %v564_v30, %v562_v29 }
 0x231   : > { %v460_v36 = vpop.f32.mrf.mxu0  ;;  %v651_v5 = vpack.c.bf16 %v603_v2, %v601_v62  ;;  %680 = vmatpush.bf16.msra.mxu2 %v633_v14  ;;  %v628_v62 = vpack.c.bf16 %v556_v59, %v554_v58  ;;  %v652_v2 = vpack.c.bf16 %v604_v1, %v602_v0  ;;  %v580_v58 = vld [vmem:[%s2015_s1 + $0x118] sm:$0xff]  ;;  %v656_v59 = vpack.c.bf16 %v612_v55, %v610_v54  ;;  %v478_v1 = vld [vmem:[%s2019_s5] sm:$0x7] }
 0x232   : > { %v473_v37 = vpop.f32.mrf.mxu1  ;;  %v480_v38 = vadd.f32 %v1377_v34, %v1379_v35  ;;  %v493_v40 = vmul.f32 %v1379_v35, %v1379_v35  ;;  %v609_v36 = vld [vmem:[%s2015_s1 + $0x200] sm:$0xff]  ;;  %720 = vmatpush.bf16.msrb.mxu1 %v632_v33  ;;  %v525_v12 = vperm.slane %v478_v1, 2 }
 0x233   : > { %692 = vmatpush.bf16.msrb.mxu3 %v651_v5  ;;  %710 = vmatpush.bf16.msra.mxu0 %v657_v23  ;;  %v611_v37 = vld [vmem:[%s2015_s1 + $0x210] sm:$0xff] }
 0x234   : > { %v482_v41 = vadd.f32 %v481_v39, %v480_v38  ;;  %v496_v45 = vadd.f32 %v494_v42, %v493_v40  ;;  %v488_v38 = vmul.f32 %v1422_v63, %v487_v22  ;;  %v655_v39 = vpack.c.bf16 %v611_v37, %v609_v36  ;;  %v557_v40 = vld [vmem:[%s2015_s1 + $0x60] sm:$0xff]  ;;  %v551_v5 = vld [vmem:[%s2015_s1 + $0x30] sm:$0xff]  ;;  %v548_v22 = vld [vmem:[%s2015_s1 + $0x18] sm:$0xff] }
 0x235   : > { %681 = vmatpush.bf16.msra.mxu2 %v631_v27  ;;  %v589_v42 = vld [vmem:[%s2015_s1 + $0x160] sm:$0xff]  ;;  %v625_v9 = vpack.c.bf16 %v551_v5, %v549_v4  ;;  %v624_v24 = vpack.c.bf16 %v548_v22, %v546_v21  ;;  %v590_v36 = vld [vmem:[%s2015_s1 + $0x168] sm:$0xff]  ;;  %v592_v37 = vld [vmem:[%s2015_s1 + $0x178] sm:$0xff] }
 0x236   : > { %483 = vadd.xlane.f32.xlu1 %v482_v41  ;;  %v498_v47 = vadd.f32 %v497_v46, %v496_v45  ;;  %v559_v41 = vld [vmem:[%s2015_s1 + $0x70] sm:$0xff]  ;;  %v558_v45 = vld [vmem:[%s2015_s1 + $0x68] sm:$0xff]  ;;  %v560_v46 = vld [vmem:[%s2015_s1 + $0x78] sm:$0xff]  ;;  %v489_v52 = vadd.f32 %v1422_v63, %v488_v38 }
 0x237   : > { %v447_v43 = vpop.f32.mrf.mxu3  ;;  %693 = vmatpush.bf16.msrb.mxu3 %v649_v18  ;;  %711 = vmatpush.bf16.msra.mxu0 %v655_v39  ;;  %v630_v48 = vpack.c.bf16 %v560_v46, %v558_v45  ;;  %v577_v18 = vld [vmem:[%s2015_s1 + $0x100] sm:$0xff]  ;;  %v646_v39 = vpack.c.bf16 %v592_v37, %v590_v36  ;;  %v588_v46 = vld [vmem:[%s2015_s1 + $0x158] sm:$0xff]  ;;  %v800_v4 = vld [vmem:[%s2017_s3 + $0x150] sm:$0xff] }
 0x238   : > { %v629_v43 = vpack.c.bf16 %v559_v41, %v557_v40  ;;  %v1541_v3 = vsel %vm490_vm3, %v1422_v63, %v489_v52  ;;  %v583_v63 = vld [vmem:[%s2015_s1 + $0x130] sm:$0xff]  ;;  %v639_v23 = vpack.c.bf16 %v579_v20, %v577_v18  ;;  %v618_v41 = vld [vmem:[%s2015_s1 + $0x248] sm:$0xff]  ;;  %v584_v52 = vld [vmem:[%s2015_s1 + $0x138] sm:$0xff] }
 0x239   : > { %721 = vmatpush.bf16.msrb.mxu1 %v630_v48  ;;  %v641_v10 = vpack.c.bf16 %v583_v63, %v581_v6  ;;  %v616_v48 = vld [vmem:[%s2015_s1 + $0x238] sm:$0xff]  ;;  %v803_v5 = vld [vmem:[%s2017_s3 + $0x168] sm:$0xff]  ;;  %v794_v6 = vld [vmem:[%s2017_s3 + $0x120] sm:$0xff] }
 0x23a   : > { %682 = vmatpush.bf16.msra.mxu2 %v629_v43  ;;  %v586_v43 = vld [vmem:[%s2015_s1 + $0x148] sm:$0xff]  ;;  %v875_v63 = vpack.c.bf16 %v803_v5, %v800_v4  ;;  %v872_v13 = vpack.c.bf16 %v797_v7, %v794_v6  ;;  %v788_v18 = vld [vmem:[%s2017_s3 + $0xf0] sm:$0xff]  ;;  %v842_v20 = vld [vmem:[%s2017_s3 + $0x2a0] sm:$0xff] }
 0x23b   : > { %694 = vmatpush.bf16.msrb.mxu3 %v647_v31  ;;  %730 = vmatpush.bf16.msrb.mxu0 %v654_v51  ;;  %v622_v31 = vld [vmem:[%s2015_s1 + $0x268] sm:$0xff]  ;;  %v644_v50 = vpack.c.bf16 %v588_v46, %v586_v43  ;;  %v789_v4 = vld [vmem:[%s2017_s3 + $0xf8] sm:$0xff]  ;;  %v792_v5 = vld [vmem:[%s2017_s3 + $0x110] sm:$0xff] }
 0x23c   : > { %v662_v33 = vpack.c.bf16 %v622_v31, %v622_v31  ;;  %v582_v51 = vld [vmem:[%s2015_s1 + $0x128] sm:$0xff]  ;;  %v764_v7 = vld [vmem:[%s2017_s3 + $0x30] sm:$0xff] }
 0x23d   : > { %722 = vmatpush.bf16.msrb.mxu1 %v628_v62 }
 0x23e   : > { %499 = vadd.xlane.f32.xlu1 %v498_v47  ;;  %v645_v47 = vpack.c.bf16 %v591_v44, %v589_v42  ;;  %683 = vmatpush.bf16.msra.mxu2 %v627_v56  ;;  %v676_v40 = vsel %vm426_vm2, %v662_v33, 0  ;;  %v620_v42 = vld [vmem:[%s2015_s1 + $0x258] sm:$0xff]  ;;  %v642_v56 = vpack.c.bf16 %v584_v52, %v582_v51 }
 0x23f   : > { %731 = vmatpush.bf16.msrb.mxu0 %v652_v2  ;;  %v660_v45 = vpack.c.bf16 %v620_v42, %v618_v41  ;;  %v801_v41 = vld [vmem:[%s2017_s3 + $0x158] sm:$0xff]  ;;  %v804_v42 = vld [vmem:[%s2017_s3 + $0x170] sm:$0xff] }
 0x240   : > { %695 = vmatpush.bf16.msrb.mxu3 %v645_v47  ;;  %v614_v47 = vld [vmem:[%s2015_s1 + $0x228] sm:$0xff]  ;;  %v876_v55 = vpack.c.bf16 %v804_v42, %v801_v41 }
 0x241   : > { %723 = vmatpush.bf16.msrb.mxu1 %v626_v11  ;;  %v658_v53 = vpack.c.bf16 %v616_v48, %v614_v47  ;;  %v833_v48 = vld [vmem:[%s2017_s3 + $0x258] sm:$0xff]  ;;  %v815_v41 = vld [vmem:[%s2017_s3 + $0x1c8] sm:$0xff] }
 0x242   : > { %684 = vmatpush.bf16.msra.mxu2 %v625_v9  ;;  %v479_v9 = vld [vmem:[%s2020_s6] sm:$0x7] }
 0x243   : > { %732 = vmatpush.bf16.msrb.mxu0 %v650_v15  ;;  %v851_v15 = vld [vmem:[%s2017_s3 + $0x2e8] sm:$0xff]  ;;  %v533_v22 = vperm.slane %v479_v9, 0  ;;  %v534_v26 = vperm.slane %v479_v9, 1 }
 0x244   : > { %696 = vmatpush.bf16.msrb.mxu3 %v643_v61  ;;  %v640_v61 = vpack.c.bf16 %v580_v58, %v578_v57  ;;  %v779_v57 = vld [vmem:[%s2017_s3 + $0xa8] sm:$0xff] }
 0x245   : > { %724 = vmatpush.bf16.msrb.mxu1 %v624_v24  ;;  %v845_v24 = vld [vmem:[%s2017_s3 + $0x2b8] sm:$0xff]  ;;  %v795_v58 = vld [vmem:[%s2017_s3 + $0x128] sm:$0xff] }
 0x246   : > { %685 = vmatpush.bf16.msra.mxu2 %v623_v19 }
 0x247   : > { %733 = vmatpush.bf16.msrb.mxu0 %v648_v28  ;;  %v896_v28 = vpack.c.bf16 %v845_v24, %v842_v20  ;;  %v780_v20 = vld [vmem:[%s2017_s3 + $0xb0] sm:$0xff]  ;;  %v802_v24 = vld [vmem:[%s2017_s3 + $0x160] sm:$0xff] }
 0x248   : > { %697 = vmatpush.bf16.msrb.mxu3 %v641_v10  ;;  %v848_v10 = vld [vmem:[%s2017_s3 + $0x2d0] sm:$0xff] }
 0x249   : > { %v899_v19 = vpack.c.bf16 %v851_v15, %v848_v10  ;;  %v786_v10 = vld [vmem:[%s2017_s3 + $0xe0] sm:$0xff]  ;;  %v761_v15 = vld [vmem:[%s2017_s3 + $0x18] sm:$0xff] }
 0x24a   : > { %747 = vmatpush.bf16.msrb.mxu2 %v676_v40  ;;  %v785_v40 = vld [vmem:[%s2017_s3 + $0xd8] sm:$0xff] }
 0x24b   : > { %734 = vmatpush.bf16.msrb.mxu0 %v646_v39  ;;  %925 = vmatpush.bf16.msra.mxu1 %v899_v19  ;;  %v782_v39 = vld [vmem:[%s2017_s3 + $0xc0] sm:$0xff] }
 0x24c   : > { %698 = vmatpush.bf16.msrb.mxu3 %v639_v23  ;;  %v524_v23 = vperm.slane %v478_v1, 1  ;;  %v866_v51 = vpack.c.bf16 %v785_v40, %v782_v39  ;;  %v812_v40 = vld [vmem:[%s2017_s3 + $0x1b0] sm:$0xff] }
 0x24d   : > { %v881_v42 = vpack.c.bf16 %v815_v41, %v812_v40  ;;  %v820_v40 = vld [vmem:[%s2017_s3 + $0x1f0] sm:$0xff]  ;;  %v823_v41 = vld [vmem:[%s2017_s3 + $0x208] sm:$0xff] }
 0x24e   : > { %748 = vmatpush.bf16.msrb.mxu2 %v660_v45 }
 0x24f   : > { %735 = vmatpush.bf16.msrb.mxu0 %v644_v50  ;;  %926 = vmatpush.bf16.msra.mxu1 %v896_v28  ;;  %v852_v50 = vld [vmem:[%s2017_s3 + $0x2f0] sm:$0xff]  ;;  %v821_v28 = vld [vmem:[%s2017_s3 + $0x1f8] sm:$0xff] }
 0x250   : > { %912 = vmatpush.bf16.msra.mxu3 %v875_v63  ;;  %v870_v63 = vpack.c.bf16 %v792_v5, %v789_v4  ;;  %v850_v5 = vld [vmem:[%s2017_s3 + $0x2e0] sm:$0xff] }
 0x252   : > { %749 = vmatpush.bf16.msrb.mxu2 %v658_v53 }
 0x253   : > { %736 = vmatpush.bf16.msrb.mxu0 %v642_v56  ;;  %v776_v56 = vld [vmem:[%s2017_s3 + $0x90] sm:$0xff] }
 0x254   : > { %913 = vmatpush.bf16.msra.mxu3 %v872_v13  ;;  %v758_v13 = vld [vmem:[%s2017_s3] sm:$0xff] }
 0x256   : > { %750 = vmatpush.bf16.msrb.mxu2 %v656_v59  ;;  %v798_v59 = vld [vmem:[%s2017_s3 + $0x140] sm:$0xff] }
 0x257   : > { %737 = vmatpush.bf16.msrb.mxu0 %v640_v61 }
 0x2a9   : > { %v484_v60 = vpop.xlane.xlu1 %483 }
 0x2aa   : > { %v1568_v14 = vmul.f32 %v1541_v3, %v484_v60 }
 0x2ac   : > { %v502_v29 = vmul.f32 %v1568_v14, %v1568_v14  ;;  %v505_v11 = vsub.f32 %v1379_v35, %v1568_v14  ;;  %v506_v16 = vsub.f32 %v1377_v34, %v1568_v14  ;;  %v791_v35 = vld [vmem:[%s2017_s3 + $0x108] sm:$0xff]  ;;  %v507_v21 = vsub.f32 %v1375_v32, %v1568_v14  ;;  %v836_v32 = vld [vmem:[%s2017_s3 + $0x270] sm:$0xff] }
 0x2ad   : > { %v523_v34 = vperm.slane %v478_v1, 0  ;;  %v869_v33 = vpack.c.bf16 %v791_v35, %v788_v18  ;;  %v839_v14 = vld [vmem:[%s2017_s3 + $0x288] sm:$0xff]  ;;  %v770_v1 = vld [vmem:[%s2017_s3 + $0x60] sm:$0xff]  ;;  %v777_v35 = vld [vmem:[%s2017_s3 + $0x98] sm:$0xff] }
 0x2ae   : > { %v893_v43 = vpack.c.bf16 %v839_v14, %v836_v32  ;;  %v827_v18 = vld [vmem:[%s2017_s3 + $0x228] sm:$0xff]  ;;  %v840_v14 = vld [vmem:[%s2017_s3 + $0x290] sm:$0xff] }
 0x2af   : > { %914 = vmatpush.bf16.msra.mxu3 %v869_v33  ;;  %v837_v33 = vld [vmem:[%s2017_s3 + $0x278] sm:$0xff] }
 0x2b0   : > { %927 = vmatpush.bf16.msra.mxu1 %v893_v43  ;;  %v765_v43 = vld [vmem:[%s2017_s3 + $0x38] sm:$0xff] }
 0x2b1   : > { %v500_v27 = vpop.xlane.xlu1 %499 }
 0x2b2   : > { %v501_v30 = vmul.f32 %v500_v27, %v1541_v3  ;;  %v535_v27 = vperm.slane %v479_v9, 2  ;;  %v783_v9 = vld [vmem:[%s2017_s3 + $0xc8] sm:$0xff] }
 0x2b3   : > { %915 = vmatpush.bf16.msra.mxu3 %v866_v51  ;;  %v790_v51 = vld [vmem:[%s2017_s3 + $0x100] sm:$0xff] }
 0x2b4   : > { %v503_v38 = vsub.f32 %v501_v30, %v502_v29 }
 0x2b6   : > { %v504_v44 = vmax.f32 %v503_v38, 0.0 }
 0x2b8   : > { %v508_v49 = vadd.f32 1e-05, %v504_v44  ;;  %v830_v44 = vld [vmem:[%s2017_s3 + $0x240] sm:$0xff] }
 0x2ba   : > { %1193 = vrsqrt.f32 %v508_v49  ;;  %vm515_vm5 = vweird.f32 %v508_v49 }
 0x2c0   : > { %v1194_v60 = vpop.eup %1193 }
 0x2c1   : > { %v510_v62 = vmul.f32 %v1194_v60, %v508_v49  ;;  %vm516_vm4 = vweird.f32 %v1194_v60  ;;  %v849_v49 = vld [vmem:[%s2017_s3 + $0x2d8] sm:$0xff] }
 0x2c2   : > { %vm517_vm6 = vmor %vm515_vm5, %vm516_vm4  ;;  %v900_v61 = vpack.c.bf16 %v852_v50, %v849_v49  ;;  %v834_v50 = vld [vmem:[%s2017_s3 + $0x260] sm:$0xff] }
 0x2c3   : > { %v511_v0 = vmul.f32 %v1194_v60, %v510_v62  ;;  %v863_v62 = vpack.c.bf16 %v779_v57, %v776_v56  ;;  %v809_v56 = vld [vmem:[%s2017_s3 + $0x198] sm:$0xff] }
 0x2c5   : > { %v512_v2 = vmul.f32 0.5, %v511_v0  ;;  %v873_v0 = vpack.c.bf16 %v798_v59, %v795_v58  ;;  %916 = vmatpush.bf16.msra.mxu3 %v863_v62  ;;  %v759_v58 = vld [vmem:[%s2017_s3 + $0x8] sm:$0xff]  ;;  %v762_v59 = vld [vmem:[%s2017_s3 + $0x20] sm:$0xff]  ;;  %v828_v62 = vld [vmem:[%s2017_s3 + $0x230] sm:$0xff] }
 0x2c7   : > { %v513_v8 = vsub.f32 1.5, %v512_v2  ;;  %v773_v2 = vld [vmem:[%s2017_s3 + $0x78] sm:$0xff] }
 0x2c8   : > { %v860_v6 = vpack.c.bf16 %v773_v2, %v770_v1  ;;  %v787_v1 = vld [vmem:[%s2017_s3 + $0xe8] sm:$0xff] }
 0x2c9   : > { %v514_v17 = vmul.f32 %v1194_v60, %v513_v8  ;;  %v767_v8 = vld [vmem:[%s2017_s3 + $0x48] sm:$0xff] }
 0x2ca   : > { %917 = vmatpush.bf16.msra.mxu3 %v860_v6  ;;  %v853_v6 = vld [vmem:[%s2017_s3 + $0x2f8] sm:$0xff] }
 0x2cb   : > { %v518_v25 = vsel %vm517_vm6, %v1194_v60, %v514_v17  ;;  %v890_v60 = vpack.c.bf16 %v833_v48, %v830_v44  ;;  %v824_v17 = vld [vmem:[%s2017_s3 + $0x210] sm:$0xff]  ;;  %v831_v48 = vld [vmem:[%s2017_s3 + $0x248] sm:$0xff] }
 0x2cc   : > { %v521_v29 = vmul.f32 %v518_v25, %v507_v21  ;;  %v519_v30 = vmul.f32 %v518_v25, %v505_v11  ;;  %v520_v31 = vmul.f32 %v518_v25, %v506_v16  ;;  %v857_v11 = vpack.c.bf16 %v767_v8, %v764_v7  ;;  %v843_v21 = vld [vmem:[%s2017_s3 + $0x2a8] sm:$0xff]  ;;  %v805_v25 = vld [vmem:[%s2017_s3 + $0x178] sm:$0xff]  ;;  %v768_v44 = vld [vmem:[%s2017_s3 + $0x50] sm:$0xff] }
 0x2cd   : > { %928 = vmatpush.bf16.msra.mxu1 %v890_v60  ;;  %v854_v16 = vpack.c.bf16 %v761_v15, %v758_v13  ;;  %v887_v19 = vpack.c.bf16 %v827_v18, %v824_v17  ;;  %v858_v49 = vpack.c.bf16 %v768_v44, %v765_v43  ;;  %v825_v60 = vld [vmem:[%s2017_s3 + $0x218] sm:$0xff]  ;;  %v819_v7 = vld [vmem:[%s2017_s3 + $0x1e8] sm:$0xff]  ;;  %v822_v8 = vld [vmem:[%s2017_s3 + $0x200] sm:$0xff]  ;;  %v886_v44 = vpack.c.bf16 %v823_v41, %v820_v40 }
 0x2ce   : > { %v531_v36 = vmul.f32 %v525_v12, %v521_v29  ;;  %v529_v37 = vmul.f32 %v523_v34, %v519_v30  ;;  %v530_v38 = vmul.f32 %v524_v23, %v520_v31  ;;  %v867_v12 = vpack.c.bf16 %v786_v10, %v783_v9  ;;  %918 = vmatpush.bf16.msra.mxu3 %v857_v11  ;;  %v846_v34 = vld [vmem:[%s2017_s3 + $0x2c0] sm:$0xff]  ;;  %v771_v30 = vld [vmem:[%s2017_s3 + $0x68] sm:$0xff]  ;;  %v781_v11 = vld [vmem:[%s2017_s3 + $0xb8] sm:$0xff] }
 0x2cf   : > { %v897_v23 = vpack.c.bf16 %v846_v34, %v843_v21  ;;  %v774_v31 = vld [vmem:[%s2017_s3 + $0x80] sm:$0xff]  ;;  %v888_v2 = vpack.c.bf16 %v828_v62, %v825_v60  ;;  %v885_v10 = vpack.c.bf16 %v822_v8, %v819_v7  ;;  %v847_v13 = vld [vmem:[%s2017_s3 + $0x2c8] sm:$0xff]  ;;  %v813_v17 = vld [vmem:[%s2017_s3 + $0x1b8] sm:$0xff] }
 0x2d0   : > { %v1707_v45 = vadd.f32 %v533_v22, %v529_v37  ;;  %v1709_v46 = vadd.f32 %v534_v26, %v530_v38  ;;  %v1711_v47 = vadd.f32 %v535_v27, %v531_v36  ;;  %v864_v22 = vpack.c.bf16 %v780_v20, %v777_v35  ;;  %v818_v26 = vld [vmem:[%s2017_s3 + $0x1e0] sm:$0xff]  ;;  %v796_v36 = vld [vmem:[%s2017_s3 + $0x130] sm:$0xff]  ;;  %v799_v37 = vld [vmem:[%s2017_s3 + $0x148] sm:$0xff] }
 0x2d1   : > { %929 = vmatpush.bf16.msra.mxu1 %v887_v19  ;;  %v877_v27 = vpack.c.bf16 %v805_v25, %v802_v24  ;;  %v884_v29 = vpack.c.bf16 %v821_v28, %v818_v26  ;;  %v861_v32 = vpack.c.bf16 %v774_v31, %v771_v30  ;;  %v894_v38 = vpack.c.bf16 %v840_v14, %v837_v33  ;;  %v778_v9 = vld [vmem:[%s2017_s3 + $0xa0] sm:$0xff]  ;;  %v816_v18 = vld [vmem:[%s2017_s3 + $0x1d0] sm:$0xff]  ;;  %v775_v20 = vld [vmem:[%s2017_s3 + $0x88] sm:$0xff] }
 0x2d2   : > { %v542_v52 = vpack.c.bf16 %v1707_v45, %v1707_v45  ;;  %v543_v53 = vpack.c.bf16 %v1709_v46, %v1709_v46  ;;  %v544_v54 = vpack.c.bf16 %v1711_v47, %v1711_v47  ;;  %919 = vmatpush.bf16.msra.mxu3 %v854_v16  ;;  %v874_v39 = vpack.c.bf16 %v799_v37, %v796_v36  ;;  %v772_v35 = vld [vmem:[%s2017_s3 + $0x70] sm:$0xff]  ;;  %v838_v21 = vld [vmem:[%s2017_s3 + $0x280] sm:$0xff]  ;;  %v841_v34 = vld [vmem:[%s2017_s3 + $0x298] sm:$0xff] }
 0x2d3   : > { %v865_v15 = vpack.c.bf16 %v781_v11, %v778_v9  ;;  %v882_v19 = vpack.c.bf16 %v816_v18, %v813_v17  ;;  %v807_v24 = vld [vmem:[%s2017_s3 + $0x188] sm:$0xff]  ;;  %v810_v25 = vld [vmem:[%s2017_s3 + $0x1a0] sm:$0xff]  ;;  %v769_v28 = vld [vmem:[%s2017_s3 + $0x58] sm:$0xff] }
 0x2d4   : > { %686 = vmatmul.bf16.vlgmr.msra.gmra.mxu2 %v542_v52  ;;  %699 = vmatmul.bf16.vlgmr.msrb.gmra.mxu3 %v543_v53  ;;  %v766_v26 = vld [vmem:[%s2017_s3 + $0x40] sm:$0xff]  ;;  %v835_v30 = vld [vmem:[%s2017_s3 + $0x268] sm:$0xff] }
 0x2d5   : > { %1139 = vmatmul.msk.bf16.vlgmr.msra.gmra.mxu0 %vm335_vm0, %v544_v54  ;;  %725 = vmatmul.bf16.vlgmr.msrb.gmra.mxu1 %v542_v52  ;;  %v793_v52 = vld [vmem:[%s2017_s3 + $0x118] sm:$0xff]  ;;  %v859_v31 = vpack.c.bf16 %v769_v28, %v766_v26  ;;  %v763_v14 = vld [vmem:[%s2017_s3 + $0x28] sm:$0xff]  ;;  %v826_v36 = vld [vmem:[%s2017_s3 + $0x220] sm:$0xff] }
 0x2d6   : > { %938 = vmatpush.bf16.msra.mxu2 %v876_v55  ;;  %951 = vmatpush.bf16.msra.mxu0 %v900_v61  ;;  %v806_v55 = vld [vmem:[%s2017_s3 + $0x180] sm:$0xff]  ;;  %v855_v61 = vpack.c.bf16 %v762_v59, %v759_v58 }
 0x2d7   : > { %964 = vmatpush.bf16.msrb.mxu3 %v877_v27  ;;  %930 = vmatpush.bf16.msra.mxu1 %v884_v29  ;;  %v878_v57 = vpack.c.bf16 %v809_v56, %v806_v55  ;;  %v879_v27 = vpack.c.bf16 %v810_v25, %v807_v24  ;;  %v832_v29 = vld [vmem:[%s2017_s3 + $0x250] sm:$0xff]  ;;  %v811_v56 = vld [vmem:[%s2017_s3 + $0x1a8] sm:$0xff] }
 0x2d8   : > { %v892_v33 = vpack.c.bf16 %v835_v30, %v832_v29  ;;  %v808_v55 = vld [vmem:[%s2017_s3 + $0x190] sm:$0xff] }
 0x2da   : > { %939 = vmatpush.bf16.msra.mxu2 %v873_v0  ;;  %952 = vmatpush.bf16.msra.mxu0 %v897_v23  ;;  %v784_v0 = vld [vmem:[%s2017_s3 + $0xd0] sm:$0xff]  ;;  %v895_v23 = vpack.c.bf16 %v841_v34, %v838_v21 }
 0x2db   : > { %965 = vmatpush.bf16.msrb.mxu3 %v874_v39  ;;  %931 = vmatpush.bf16.msra.mxu1 %v881_v42  ;;  %v868_v4 = vpack.c.bf16 %v787_v1, %v784_v0 }
 0x2de   : > { %940 = vmatpush.bf16.msra.mxu2 %v870_v63  ;;  %953 = vmatpush.bf16.msra.mxu0 %v894_v38  ;;  %v901_v63 = vpack.c.bf16 %v853_v6, %v850_v5  ;;  %v829_v38 = vld [vmem:[%s2017_s3 + $0x238] sm:$0xff] }
 0x2df   : > { %932 = vmatpush.bf16.msra.mxu1 %v878_v57  ;;  %v889_v39 = vpack.c.bf16 %v829_v38, %v826_v36 }
 0x2e2   : > { %941 = vmatpush.bf16.msra.mxu2 %v867_v12  ;;  %v844_v12 = vld [vmem:[%s2017_s3 + $0x2b0] sm:$0xff] }
 0x2e3   : > { %977 = vmatpush.bf16.msrb.mxu1 %v901_v63  ;;  %v898_v16 = vpack.c.bf16 %v847_v13, %v844_v12 }
 0x2e4   : > { %1140 = vmatmul.msk.bf16.vlgmr.msrb.gmra.mxu2 %vm335_vm0, %v544_v54  ;;  %v871_v54 = vpack.c.bf16 %v793_v52, %v790_v51 }
 0x2e5   : > { %738 = vmatmul.bf16.vlgmr.msrb.gmra.mxu0 %v543_v53  ;;  %v891_v53 = vpack.c.bf16 %v834_v50, %v831_v48  ;;  %v663_v48 = vld [vmem:[%s2016_s2] sm:$0x3]  ;;  %v817_v50 = vld [vmem:[%s2017_s3 + $0x1d8] sm:$0xff] }
 0x2e6   : > { %942 = vmatpush.bf16.msra.mxu2 %v864_v22  ;;  %966 = vmatpush.bf16.msrb.mxu3 %v871_v54  ;;  %v862_v22 = vpack.c.bf16 %v775_v20, %v772_v35  ;;  %v665_v51 = vperm.slane %v663_v48, 0  ;;  %v904_v20 = vld [vmem:[%s2018_s4] sm:$0x7] }
 0x2e7   : > { %954 = vmatpush.bf16.msra.mxu0 %v891_v53  ;;  %978 = vmatpush.bf16.msrb.mxu1 %v898_v16  ;;  %v906_v21 = vperm.slane %v904_v20, 0  ;;  %v907_v34 = vperm.slane %v904_v20, 1 }
 0x2ea   : > { %943 = vmatpush.bf16.msra.mxu2 %v861_v32  ;;  %967 = vmatpush.bf16.msrb.mxu3 %v868_v4  ;;  %v760_v32 = vld [vmem:[%s2017_s3 + $0x10] sm:$0xff]  ;;  %v666_v4 = vperm.slane %v663_v48, 1 }
 0x2eb   : > { %955 = vmatpush.bf16.msra.mxu0 %v888_v2  ;;  %979 = vmatpush.bf16.msrb.mxu1 %v895_v23  ;;  %v856_v37 = vpack.c.bf16 %v763_v14, %v760_v32 }
 0x2ee   : > { %944 = vmatpush.bf16.msra.mxu2 %v858_v49  ;;  %968 = vmatpush.bf16.msrb.mxu3 %v865_v15  ;;  %v814_v49 = vld [vmem:[%s2017_s3 + $0x1c0] sm:$0xff] }
 0x2ef   : > { %956 = vmatpush.bf16.msra.mxu0 %v885_v10  ;;  %980 = vmatpush.bf16.msrb.mxu1 %v892_v33  ;;  %v883_v52 = vpack.c.bf16 %v817_v50, %v814_v49 }
 0x2f2   : > { %945 = vmatpush.bf16.msra.mxu2 %v855_v61  ;;  %969 = vmatpush.bf16.msrb.mxu3 %v862_v22  ;;  %v880_v61 = vpack.c.bf16 %v811_v56, %v808_v55 }
 0x2f3   : > { %957 = vmatpush.bf16.msra.mxu0 %v882_v19  ;;  %981 = vmatpush.bf16.msrb.mxu1 %v889_v39 }
 0x2f6   : > { %970 = vmatpush.bf16.msrb.mxu3 %v859_v31 }
 0x2f7   : > { %958 = vmatpush.bf16.msra.mxu0 %v879_v27  ;;  %982 = vmatpush.bf16.msrb.mxu1 %v886_v44  ;;  %v908_v27 = vperm.slane %v904_v20, 2 }
 0x2fa   : > { %971 = vmatpush.bf16.msrb.mxu3 %v856_v37 }
 0x2fb   : > { %983 = vmatpush.bf16.msrb.mxu1 %v883_v52 }
 0x2ff   : > { %984 = vmatpush.bf16.msrb.mxu1 %v880_v61  ;;  %v993_v61 = vld [vmem:[%s2021_s7] sm:$0x7] }
 0x352   : > { %v713_v42 = vpop.f32.mrf.mxu0  ;;  %v726_v43 = vpop.f32.mrf.mxu1 }
 0x353   : > { %v727_v63 = vadd.f32 %v726_v43, %v666_v4  ;;  %v1031_v4 = vperm.slane %v993_v61, 0 }
 0x357   : > { %v687_v53 = vpop.f32.mrf.mxu2  ;;  %v700_v54 = vpop.f32.mrf.mxu3 }
 0x358   : > { %v688_v57 = vadd.f32 %v687_v53, %v665_v51 }
 0x35a   : > { %v701_v58 = vadd.f32 %v700_v54, %v688_v57  ;;  %v715_v59 = vpop.f32.mrf.mxu0  ;;  %v728_v60 = vpop.f32.mrf.mxu1 }
 0x35c   : > { %v714_v62 = vadd.f32 %v713_v42, %v701_v58 }
 0x35e   : > { %v756_v0 = vmax.f32 %v714_v62, 0.0 }
 0x35f   : > { %v689_v1 = vpop.f32.mrf.mxu2  ;;  %v702_v2 = vpop.f32.mrf.mxu3 }
 0x360   : > { %v902_v5 = vpack.c.bf16 %v756_v0, %v756_v0 }
 0x362   : > { %v739_v6 = vpop.f32.mrf.mxu0  ;;  %920 = vmatmul.bf16.vlgmr.msra.gmra.mxu3 %v902_v5  ;;  %946 = vmatmul.bf16.vlgmr.msra.gmra.mxu2 %v902_v5 }
 0x363   : > { %v740_v7 = vadd.f32 %v739_v6, %v727_v63  ;;  %v1033_v6 = vperm.slane %v993_v61, 2 }
 0x367   : > { %v752_v8 = vpop.f32.mrf.mxu2 }
 0x368   : > { %v753_v9 = vadd.f32 %v752_v8, %v740_v7 }
 0x36a   : > { %v757_v10 = vmax.f32 %v753_v9, 0.0  ;;  %v741_v11 = vpop.f32.mrf.mxu0 }
 0x36c   : > { %v903_v12 = vpack.c.bf16 %v757_v10, %v757_v10 }
 0x36e   : > { %933 = vmatmul.bf16.vlgmr.msra.gmra.mxu1 %v903_v12  ;;  %959 = vmatmul.bf16.vlgmr.msra.gmra.mxu0 %v903_v12 }
 0x36f   : > { %v754_v13 = vpop.f32.mrf.mxu2 }
 0x372   : > { %972 = vmatmul.bf16.vlgmr.msrb.gmra.mxu3 %v902_v5  ;;  %v1032_v5 = vperm.slane %v993_v61, 1 }
 0x37e   : > { %985 = vmatmul.bf16.vlgmr.msrb.gmra.mxu1 %v903_v12 }
 0x3e5   : > { %v921_v15 = vpop.f32.mrf.mxu3  ;;  %v947_v16 = vpop.f32.mrf.mxu2 }
 0x3e6   : > { %v922_v24 = vadd.f32 %v921_v15, %v906_v21  ;;  %v948_v25 = vadd.f32 %v947_v16, %v907_v34 }
 0x3eb   : > { %v934_v17 = vpop.f32.mrf.mxu1  ;;  %v960_v18 = vpop.f32.mrf.mxu0 }
 0x3ec   : > { %v935_v28 = vadd.f32 %v934_v17, %v922_v24  ;;  %v961_v29 = vadd.f32 %v960_v18, %v948_v25 }
 0x3ed   : > { %v923_v35 = vpop.f32.mrf.mxu3  ;;  %v949_v19 = vpop.f32.mrf.mxu2 }
 0x3ee   : > { %v990_v31 = vadd.f32 %v935_v28, %v1707_v45  ;;  %v991_v33 = vadd.f32 %v961_v29, %v1709_v46 }
 0x3f0   : > { %v995_v38 = vadd.f32 %v991_v33, %v990_v31  ;;  %v1001_v43 = vmul.f32 %v990_v31, %v990_v31  ;;  %v1002_v44 = vmul.f32 %v991_v33, %v991_v33 }
 0x3f2   : > { %v1004_v45 = vadd.f32 %v1002_v44, %v1001_v43 }
 0x3f3   : > { %v936_v22 = vpop.f32.mrf.mxu1  ;;  %v962_v23 = vpop.f32.mrf.mxu0 }
 0x3f5   : > { %v973_v26 = vpop.f32.mrf.mxu3 }
 0x3f6   : > { %v974_v30 = vadd.f32 %v973_v26, %v908_v27 }
 0x3fb   : > { %v986_v32 = vpop.f32.mrf.mxu1 }
 0x3fc   : > { %v987_v14 = vadd.f32 %v986_v32, %v974_v30 }
 0x3fd   : > { %v975_v36 = vpop.f32.mrf.mxu3 }
 0x3fe   : > { %v992_v37 = vadd.f32 %v987_v14, %v1711_v47 }
 0x400   : > { %v996_v39 = vsel %vm335_vm0, %v992_v37, 0.0  ;;  %v1003_v41 = vmul.f32 %v992_v37, %v992_v37 }
 0x401   : > { %v997_v40 = vadd.f32 %v996_v39, %v995_v38 }
 0x402   : > { %v1005_v48 = vsel %vm335_vm0, %v1003_v41, 0.0 }
 0x403   : > { %v988_v42 = vpop.f32.mrf.mxu1  ;;  %998 = vadd.xlane.f32.xlu2 %v997_v40  ;;  %v1006_v49 = vadd.f32 %v1005_v48, %v1004_v45 }
 0x40b   : > { %1007 = vadd.xlane.f32.xlu2 %v1006_v49 }
 0x476   : > { %v999_v46 = vpop.xlane.xlu2 %998 }
 0x477   : > { %v1000_v50 = vmul.f32 %v999_v46, %v1541_v3 }
 0x479   : > { %v1010_v51 = vmul.f32 %v1000_v50, %v1000_v50  ;;  %v1013_v62 = vsub.f32 %v990_v31, %v1000_v50  ;;  %v1014_v0 = vsub.f32 %v991_v33, %v1000_v50  ;;  %v1015_v2 = vsub.f32 %v992_v37, %v1000_v50 }
 0x47e   : > { %v1008_v47 = vpop.xlane.xlu2 %1007 }
 0x47f   : > { %v1009_v52 = vmul.f32 %v1008_v47, %v1541_v3  ;;  %v994_v3 = vld [vmem:[%s2022_s8] sm:$0x7] }
 0x480   : > { %v1041_v7 = vperm.slane %v994_v3, 0  ;;  %v1042_v8 = vperm.slane %v994_v3, 1  ;;  %v1043_v12 = vperm.slane %v994_v3, 2 }
 0x481   : > { %v1011_v53 = vsub.f32 %v1009_v52, %v1010_v51 }
 0x483   : > { %v1012_v54 = vmax.f32 %v1011_v53, 0.0 }
 0x485   : > { %v1016_v55 = vadd.f32 1e-05, %v1012_v54 }
 0x487   : > { %1195 = vrsqrt.f32 %v1016_v55  ;;  %vm1023_vm8 = vweird.f32 %v1016_v55 }
 0x48d   : > { %v1196_v56 = vpop.eup %1195 }
 0x48e   : > { %v1018_v57 = vmul.f32 %v1196_v56, %v1016_v55  ;;  %vm1024_vm7 = vweird.f32 %v1196_v56 }
 0x48f   : > { %vm1025_vm9 = vmor %vm1023_vm8, %vm1024_vm7 }
 0x490   : > { %v1019_v58 = vmul.f32 %v1196_v56, %v1018_v57 }
 0x492   : > { %v1020_v59 = vmul.f32 0.5, %v1019_v58 }
 0x494   : > { %v1021_v60 = vsub.f32 1.5, %v1020_v59 }
 0x496   : > { %v1022_v1 = vmul.f32 %v1196_v56, %v1021_v60 }
 0x498   : > { %v1026_v63 = vsel %vm1025_vm9, %v1196_v56, %v1022_v1 }
 0x499   : > { %v1027_v9 = vmul.f32 %v1026_v63, %v1013_v62  ;;  %v1028_v10 = vmul.f32 %v1026_v63, %v1014_v0  ;;  %v1029_v11 = vmul.f32 %v1026_v63, %v1015_v2 }
 0x49b   : > { %v1037_v13 = vmul.f32 %v1031_v4, %v1027_v9  ;;  %v1038_v15 = vmul.f32 %v1032_v5, %v1028_v10  ;;  %v1039_v16 = vmul.f32 %v1033_v6, %v1029_v11 }
 0x49d   : > { %v1047_v17 = vadd.f32 %v1041_v7, %v1037_v13  ;;  %v1048_v18 = vadd.f32 %v1042_v8, %v1038_v15  ;;  %v1049_v35 = vadd.f32 %v1043_v12, %v1039_v16 }
 0x49f   : > { %1050 = vst [vmem:[%s325_s16] sm:$0xff] %v1047_v17 }
 0x4a0   : > { %1051 = vst [vmem:[%s325_s16 + $0x8] sm:$0xff] %v1048_v18 }
 0x4a1   : > { %1052 = vst.msk [vmem:[%s325_s16 + $0x10] sm:$0xff] %vm335_vm0, %v1049_v35 }
 0x4a2   : > { %1224 = shalt.err (!%p1221_p3)
}
 0x4a3   : > { %1147 = dma.vmem_to_hbm [thread:$0]  (%p1350_p5), %s1068_s17, 384, %s1070_s21, %s1054_s24  }
 0x4a4 PF: > { %p1153_p4 = scmp.ge.s32.totalorder %s1259_s12, 2  ;;  %s1081_s22 = sand.u32 1, %s1247_s30  }
 0x4a5   : > { %s1082_s13 = scalar_lea.sflag [#allocation3], %s1081_s22 }
 0x4a6   : > { %p1150_p7 = pnand %p1153_p4, %p1354_p6 }
 0x4a8   : > { %p1151_p8 = pneg %p1150_p7 }
 0x4aa   : > { %1242 = dma.done.wait (%p1151_p8), %s1082_s13, 384  }
 0x4ab   : > { %1244 = vsyncadd (%p1151_p8), %s1082_s13, 4294966912  ;;  %p19_p9 = scmp.ge.s32.totalorder %s1337_s15, 4   ;;  %s2026_s30 = smov %s1251_s10 }
 0x4ac   : > { %s2027_s10 = smov %s1255_s11  ;;  %s2028_s11 = smov %s1348_s18 }
 0x4ad   : > { %s2029_s12 = smov %s1337_s15  ;;  %21 = sbr.rel (!%p19_p9) target bundleno = 3 (0x3), region = 91 }
 0x4b2   :  { %1088 = vsyncpa [#allocation3], 1 }
 0x4b3   :  { %1090 = vsyncpa [#allocation3 + $0x1], 1 }

</bundles_post_ra>
